<compile_context>
chip_gen: v5e
topology: v5e:2x2
jax: 0.10.0
libtpu: 0.0.40
codegen_flags: <defaults>
</compile_context>

<pallas_src>
import functools

import jax
import jax.numpy as jnp
from jax import lax
from jax.experimental import pallas as pl
from jax.experimental.pallas import tpu as pltpu

_LANE = 128


def _conv_tap_kernel(xm_ref, xh_ref, w_ref, b_ref, o_ref, *, KH, KW, Wp):
    """out = sum_{taps} w[tap] @ shift(x, tap) + b, for one (batch, hw_tile) block.

    xm_ref: (Cin, L)           main slab: flattened padded spatial lanes of this tile
    xh_ref: (Cin, Hh)          halo: the lanes immediately following the main slab
    w_ref : (KH*KW, Cout, Cin) repacked conv weight (tap-major)
    b_ref : (Cout, 1)          bias, f32
    o_ref : (Cout, L)          output tile (lane-dense, multiple of 128)
    """
    cout, L = o_ref.shape
    # main ++ halo -> (Cin, L + Hh); every tap-shifted window is a static slice of it.
    slab = jnp.concatenate([xm_ref[...], xh_ref[...]], axis=-1)
    acc = jnp.zeros((cout, L), dtype=jnp.float32)
    # Unrolled tap loop: KH*KW small MXU matmuls accumulated in f32 (VPU adds);
    # the lane shifts ride the XLU slot, the matmuls the MXU slot -> good overlap.
    for kh in range(KH):
        for kw in range(KW):
            off = kh * Wp + kw                       # flat shift of tap (kh, kw)
            xs = slab[:, off:off + L]                # (Cin, L) shifted view (VMEM only)
            acc = acc + jnp.dot(w_ref[kh * KW + kw], xs,
                                preferred_element_type=jnp.float32)
    # f32 epilogue (bias add) then single cast to the output dtype.
    o_ref[...] = (acc + b_ref[...]).astype(o_ref.dtype)


def my_conv2d(x, w, b, padding="same", stride=1, *,
              max_tile_lanes=None, compute_dtype=None):
    """Pallas equivalent of torch.nn.functional.conv2d(x, w, b, padding='same', stride=1).

    x: (N, Cin, H, W)   w: (Cout, Cin, KH, KW)   b: (Cout,)
    compute_dtype: optional (e.g. jnp.bfloat16) dtype for x/w on the MXU;
                   accumulation and bias stay f32, output keeps x.dtype.
    """
    assert padding == "same" and stride == 1, "module forward uses padding='same', stride=1"
    N, Cin, H, W = x.shape
    Cout, Cin_w, KH, KW = w.shape
    assert Cin == Cin_w

    # 'same' padding; extra pad goes on bottom/right for even kernels (matches torch).
    pad_h, pad_w = KH - 1, KW - 1
    ph_lo, pw_lo = pad_h // 2, pad_w // 2
    xp = jnp.pad(x, ((0, 0), (0, 0), (ph_lo, pad_h - ph_lo), (pw_lo, pad_w - pw_lo)))
    Hp, Wp = H + pad_h, W + pad_w

    # Flatten padded spatial dims into a single lane axis.  Output position
    # p = h*Wp + w (only w < W is valid); tap (kh, kw) reads flat position
    # p + kh*Wp + kw, so every tap is just a lane shift of the same slab.
    Lflat = H * Wp                          # flat positions that carry outputs
    max_off = (KH - 1) * Wp + (KW - 1)      # largest tap shift (halo size needed)

    cdt = x.dtype if compute_dtype is None else jnp.dtype(compute_dtype)
    isz = jnp.dtype(cdt).itemsize
    osz = jnp.dtype(x.dtype).itemsize

    # ---- lane-tile selection: multiple of 128, sized for a VMEM budget that is
    # safe on all generations.  Per output lane we account for:
    #   2*Cin   double-buffered input block      (compute dtype)
    #   2*Cin   in-kernel slab copy + shifted-slice temp (compute dtype)
    #   2*Cout  double-buffered output block     (output dtype)
    #   Cout    f32 accumulator
    min_l = _LANE * (-(-max_off // _LANE))  # tile must be able to host the halo
    full_l = _LANE * (-(-Lflat // _LANE))   # whole image in one lane-padded tile
    if max_tile_lanes is None:
        budget = 12 * 1024 * 1024           # conservative: < v5e's 16 MiB default scope
        per_lane = 4 * Cin * isz + 2 * Cout * osz + Cout * 4
        max_tile_lanes = min(8192, max(_LANE, (budget // per_lane) // _LANE * _LANE))
    L = max(min_l, min(full_l, (max_tile_lanes // _LANE) * _LANE))
    T = -(-Lflat // L)                      # number of hw tiles per batch element
    P = T * L                               # padded flat output length
    # Halo block: smallest multiple of 128 that divides L and covers max_off
    # (so its element offset (t+1)*L is a whole number of halo blocks).
    Hh = next(d for d in range(_LANE, L + 1, _LANE) if L % d == 0 and d >= max_off)

    xf = xp.reshape(N, Cin, Hp * Wp).astype(cdt)
    xf = jnp.pad(xf, ((0, 0), (0, 0), (0, P + Hh - Hp * Wp)))   # zero tail, never valid

    # w3[kh*KW + kw, co, ci] == w[co, ci, kh, kw]
    w3 = jnp.transpose(w, (2, 3, 0, 1)).reshape(KH * KW, Cout, Cin).astype(cdt)
    b2 = b.reshape(Cout, 1).astype(jnp.float32)

    kernel = functools.partial(_conv_tap_kernel, KH=KH, KW=KW, Wp=Wp)

    flops = 2 * N * Cout * Cin * KH * KW * H * W
    bytes_accessed = int((N * Cin * (P + T * Hh) + w3.size) * isz
                         + b2.size * 4
                         + N * Cout * P * osz)

    out_flat = pl.pallas_call(
        kernel,
        out_shape=jax.ShapeDtypeStruct((N, Cout, P), x.dtype),
        grid_spec=pltpu.PrefetchScalarGridSpec(
            num_scalar_prefetch=0,
            grid=(N, T),
            in_specs=[
                # main slab of this hw tile (lane-dense, multiple of 128)
                pl.BlockSpec((None, Cin, L), lambda n, t: (n, 0, t)),
                # halo = the Hh lanes immediately after the main slab (same array,
                # different index_map) — avoids any materialized halo/im2col copy.
                pl.BlockSpec((None, Cin, Hh),
                             lambda n, t: (n, 0, (t + 1) * (L // Hh))),
                # weight / bias: constant block index -> stays resident in VMEM.
                pl.BlockSpec((KH * KW, Cout, Cin), lambda n, t: (0, 0, 0)),
                pl.BlockSpec((Cout, 1), lambda n, t: (0, 0)),
            ],
            out_specs=pl.BlockSpec((None, Cout, L), lambda n, t: (n, 0, t)),
        ),
        compiler_params=pltpu.CompilerParams(
            dimension_semantics=("parallel", "parallel"),
            vmem_limit_bytes=32 * 1024 * 1024,   # explicit; valid on v5e/v6e/v7x
        ),
        cost_estimate=pl.CostEstimate(
            flops=flops, transcendentals=0, bytes_accessed=bytes_accessed),
    )(xf, xf, w3, b2)

    # Drop flat padding and junk columns (w >= W), back to NCHW.
    out = out_flat[:, :, :Lflat].reshape(N, Cout, H, Wp)[:, :, :, :W]
    return out


if __name__ == "__main__":
    key = jax.random.PRNGKey(0)
    kx, kw_, kb = jax.random.split(key, 3)

    N, Cin, H, W = 2, 4, 16, 16
    Cout, KH, KW = 8, 3, 3

    x = jax.random.normal(kx, (N, Cin, H, W), dtype=jnp.float32)
    w = jax.random.normal(kw_, (Cout, Cin, KH, KW), dtype=jnp.float32) * 0.1
    b = jax.random.normal(kb, (Cout,), dtype=jnp.float32)

    ref = lax.conv_general_dilated(
        x, w, window_strides=(1, 1), padding="SAME",
        dimension_numbers=("NCHW", "OIHW", "NCHW"),
    ) + b.reshape(1, Cout, 1, 1)

    # Default path: largest lane tile within the VMEM budget (single hw tile here).
    out = jax.block_until_ready(my_conv2d(x, w, b))
    assert out.shape == (N, Cout, H, W)
    assert jnp.allclose(out, ref, atol=1e-4, rtol=1e-4)

    # Explicitly exercise the multi-tile path (hw grid axis + halo block).
    out_tiled = jax.block_until_ready(my_conv2d(x, w, b, max_tile_lanes=128))
    assert jnp.allclose(out_tiled, ref, atol=1e-4, rtol=1e-4)

    # Optional bf16 compute path (f32 accumulation) — halves HBM/VMEM bytes on real shapes.
    out_bf16 = jax.block_until_ready(my_conv2d(x, w, b, compute_dtype=jnp.bfloat16))
    assert jnp.allclose(out_bf16, ref, atol=5e-2, rtol=5e-2)

    print("KERNEL_OK")
</pallas_src>

<mosaic_0001>
module attributes {stable_mosaic.version = 11 : i64} {
  func.func @_conv_tap_kernel(%arg0: i32, %arg1: i32, %arg2: memref<1x4x384xf32, #tpu.memory_space<vmem>>, %arg3: memref<1x4x128xf32, #tpu.memory_space<vmem>>, %arg4: memref<9x8x4xf32, #tpu.memory_space<vmem>>, %arg5: memref<8x1xf32, #tpu.memory_space<vmem>>, %arg6: memref<1x8x384xf32, #tpu.memory_space<vmem>>) attributes {dimension_semantics = [#tpu.dimension_semantics<parallel>, #tpu.dimension_semantics<parallel>], iteration_bounds = array<i64: 2, 1>, scalar_prefetch = 0 : i64, scratch_operands = 0 : i64, tpu.core_type = #tpu.core_type<tc>, window_params = [{transform_indices = @transform_0, window_bounds = array<i64: 1, 4, 384>}, {transform_indices = @transform_1, window_bounds = array<i64: 1, 4, 128>}, {pipeline_mode = #tpu.pipeline_mode<synchronous>, transform_indices = @transform_2, window_bounds = array<i64: 9, 8, 4>}, {pipeline_mode = #tpu.pipeline_mode<synchronous>, transform_indices = @transform_3, window_bounds = array<i64: 8, 1>}, {transform_indices = @transform_4, window_bounds = array<i64: 1, 8, 384>}]} {
    %c0 = arith.constant 0 : index
    %c0_0 = arith.constant 0 : index
    %c0_1 = arith.constant 0 : index
    %0 = vector.load %arg2[%c0, %c0_0, %c0_1] : memref<1x4x384xf32, #tpu.memory_space<vmem>>, vector<1x4x384xf32>
    %1 = vector.shape_cast %0 : vector<1x4x384xf32> to vector<4x384xf32>
    %c0_2 = arith.constant 0 : index
    %c0_3 = arith.constant 0 : index
    %c0_4 = arith.constant 0 : index
    %2 = vector.load %arg3[%c0_2, %c0_3, %c0_4] : memref<1x4x128xf32, #tpu.memory_space<vmem>>, vector<1x4x128xf32>
    %3 = vector.shape_cast %2 : vector<1x4x128xf32> to vector<4x128xf32>
    %4 = tpu.concatenate %1, %3 in 1 : vector<4x384xf32>, vector<4x128xf32> -> vector<4x512xf32>
    %cst = arith.constant 0.000000e+00 : f32
    %5 = vector.broadcast %cst : f32 to vector<8x384xf32>
    %6 = vector.extract_strided_slice %4 {offsets = [0, 0], sizes = [4, 384], strides = [1, 1]} : vector<4x512xf32> to vector<4x384xf32>
    %c0_5 = arith.constant 0 : index
    %c0_6 = arith.constant 0 : index
    %c0_7 = arith.constant 0 : index
    %7 = vector.load %arg4[%c0_5, %c0_6, %c0_7] : memref<9x8x4xf32, #tpu.memory_space<vmem>>, vector<1x8x4xf32>
    %8 = vector.shape_cast %7 : vector<1x8x4xf32> to vector<8x4xf32>
    %cst_8 = arith.constant dense<0.000000e+00> : vector<8x384xf32>
    %9 = tpu.matmul %8, %6, %cst_8 {dimension_numbers = #tpu.dot_dimension_numbers<[1], [0], [0], [1], [0, 0, 1, 1], [], []>} : vector<8x4xf32>, vector<4x384xf32>, vector<8x384xf32> -> vector<8x384xf32>
    %10 = arith.addf %5, %9 : vector<8x384xf32>
    %11 = vector.extract_strided_slice %4 {offsets = [0, 1], sizes = [4, 384], strides = [1, 1]} : vector<4x512xf32> to vector<4x384xf32>
    %c1 = arith.constant 1 : index
    %c0_9 = arith.constant 0 : index
    %c0_10 = arith.constant 0 : index
    %12 = vector.load %arg4[%c1, %c0_9, %c0_10] : memref<9x8x4xf32, #tpu.memory_space<vmem>>, vector<1x8x4xf32>
    %13 = vector.shape_cast %12 : vector<1x8x4xf32> to vector<8x4xf32>
    %cst_11 = arith.constant dense<0.000000e+00> : vector<8x384xf32>
    %14 = tpu.matmul %13, %11, %cst_11 {dimension_numbers = #tpu.dot_dimension_numbers<[1], [0], [0], [1], [0, 0, 1, 1], [], []>} : vector<8x4xf32>, vector<4x384xf32>, vector<8x384xf32> -> vector<8x384xf32>
    %15 = arith.addf %10, %14 : vector<8x384xf32>
    %16 = vector.extract_strided_slice %4 {offsets = [0, 2], sizes = [4, 384], strides = [1, 1]} : vector<4x512xf32> to vector<4x384xf32>
    %c2 = arith.constant 2 : index
    %c0_12 = arith.constant 0 : index
    %c0_13 = arith.constant 0 : index
    %17 = vector.load %arg4[%c2, %c0_12, %c0_13] : memref<9x8x4xf32, #tpu.memory_space<vmem>>, vector<1x8x4xf32>
    %18 = vector.shape_cast %17 : vector<1x8x4xf32> to vector<8x4xf32>
    %cst_14 = arith.constant dense<0.000000e+00> : vector<8x384xf32>
    %19 = tpu.matmul %18, %16, %cst_14 {dimension_numbers = #tpu.dot_dimension_numbers<[1], [0], [0], [1], [0, 0, 1, 1], [], []>} : vector<8x4xf32>, vector<4x384xf32>, vector<8x384xf32> -> vector<8x384xf32>
    %20 = arith.addf %15, %19 : vector<8x384xf32>
    %21 = vector.extract_strided_slice %4 {offsets = [0, 18], sizes = [4, 384], strides = [1, 1]} : vector<4x512xf32> to vector<4x384xf32>
    %c3 = arith.constant 3 : index
    %c0_15 = arith.constant 0 : index
    %c0_16 = arith.constant 0 : index
    %22 = vector.load %arg4[%c3, %c0_15, %c0_16] : memref<9x8x4xf32, #tpu.memory_space<vmem>>, vector<1x8x4xf32>
    %23 = vector.shape_cast %22 : vector<1x8x4xf32> to vector<8x4xf32>
    %cst_17 = arith.constant dense<0.000000e+00> : vector<8x384xf32>
    %24 = tpu.matmul %23, %21, %cst_17 {dimension_numbers = #tpu.dot_dimension_numbers<[1], [0], [0], [1], [0, 0, 1, 1], [], []>} : vector<8x4xf32>, vector<4x384xf32>, vector<8x384xf32> -> vector<8x384xf32>
    %25 = arith.addf %20, %24 : vector<8x384xf32>
    %26 = vector.extract_strided_slice %4 {offsets = [0, 19], sizes = [4, 384], strides = [1, 1]} : vector<4x512xf32> to vector<4x384xf32>
    %c4 = arith.constant 4 : index
    %c0_18 = arith.constant 0 : index
    %c0_19 = arith.constant 0 : index
    %27 = vector.load %arg4[%c4, %c0_18, %c0_19] : memref<9x8x4xf32, #tpu.memory_space<vmem>>, vector<1x8x4xf32>
    %28 = vector.shape_cast %27 : vector<1x8x4xf32> to vector<8x4xf32>
    %cst_20 = arith.constant dense<0.000000e+00> : vector<8x384xf32>
    %29 = tpu.matmul %28, %26, %cst_20 {dimension_numbers = #tpu.dot_dimension_numbers<[1], [0], [0], [1], [0, 0, 1, 1], [], []>} : vector<8x4xf32>, vector<4x384xf32>, vector<8x384xf32> -> vector<8x384xf32>
    %30 = arith.addf %25, %29 : vector<8x384xf32>
    %31 = vector.extract_strided_slice %4 {offsets = [0, 20], sizes = [4, 384], strides = [1, 1]} : vector<4x512xf32> to vector<4x384xf32>
    %c5 = arith.constant 5 : index
    %c0_21 = arith.constant 0 : index
    %c0_22 = arith.constant 0 : index
    %32 = vector.load %arg4[%c5, %c0_21, %c0_22] : memref<9x8x4xf32, #tpu.memory_space<vmem>>, vector<1x8x4xf32>
    %33 = vector.shape_cast %32 : vector<1x8x4xf32> to vector<8x4xf32>
    %cst_23 = arith.constant dense<0.000000e+00> : vector<8x384xf32>
    %34 = tpu.matmul %33, %31, %cst_23 {dimension_numbers = #tpu.dot_dimension_numbers<[1], [0], [0], [1], [0, 0, 1, 1], [], []>} : vector<8x4xf32>, vector<4x384xf32>, vector<8x384xf32> -> vector<8x384xf32>
    %35 = arith.addf %30, %34 : vector<8x384xf32>
    %36 = vector.extract_strided_slice %4 {offsets = [0, 36], sizes = [4, 384], strides = [1, 1]} : vector<4x512xf32> to vector<4x384xf32>
    %c6 = arith.constant 6 : index
    %c0_24 = arith.constant 0 : index
    %c0_25 = arith.constant 0 : index
    %37 = vector.load %arg4[%c6, %c0_24, %c0_25] : memref<9x8x4xf32, #tpu.memory_space<vmem>>, vector<1x8x4xf32>
    %38 = vector.shape_cast %37 : vector<1x8x4xf32> to vector<8x4xf32>
    %cst_26 = arith.constant dense<0.000000e+00> : vector<8x384xf32>
    %39 = tpu.matmul %38, %36, %cst_26 {dimension_numbers = #tpu.dot_dimension_numbers<[1], [0], [0], [1], [0, 0, 1, 1], [], []>} : vector<8x4xf32>, vector<4x384xf32>, vector<8x384xf32> -> vector<8x384xf32>
    %40 = arith.addf %35, %39 : vector<8x384xf32>
    %41 = vector.extract_strided_slice %4 {offsets = [0, 37], sizes = [4, 384], strides = [1, 1]} : vector<4x512xf32> to vector<4x384xf32>
    %c7 = arith.constant 7 : index
    %c0_27 = arith.constant 0 : index
    %c0_28 = arith.constant 0 : index
    %42 = vector.load %arg4[%c7, %c0_27, %c0_28] : memref<9x8x4xf32, #tpu.memory_space<vmem>>, vector<1x8x4xf32>
    %43 = vector.shape_cast %42 : vector<1x8x4xf32> to vector<8x4xf32>
    %cst_29 = arith.constant dense<0.000000e+00> : vector<8x384xf32>
    %44 = tpu.matmul %43, %41, %cst_29 {dimension_numbers = #tpu.dot_dimension_numbers<[1], [0], [0], [1], [0, 0, 1, 1], [], []>} : vector<8x4xf32>, vector<4x384xf32>, vector<8x384xf32> -> vector<8x384xf32>
    %45 = arith.addf %40, %44 : vector<8x384xf32>
    %46 = vector.extract_strided_slice %4 {offsets = [0, 38], sizes = [4, 384], strides = [1, 1]} : vector<4x512xf32> to vector<4x384xf32>
    %c8 = arith.constant 8 : index
    %c0_30 = arith.constant 0 : index
    %c0_31 = arith.constant 0 : index
    %47 = vector.load %arg4[%c8, %c0_30, %c0_31] : memref<9x8x4xf32, #tpu.memory_space<vmem>>, vector<1x8x4xf32>
    %48 = vector.shape_cast %47 : vector<1x8x4xf32> to vector<8x4xf32>
    %cst_32 = arith.constant dense<0.000000e+00> : vector<8x384xf32>
    %49 = tpu.matmul %48, %46, %cst_32 {dimension_numbers = #tpu.dot_dimension_numbers<[1], [0], [0], [1], [0, 0, 1, 1], [], []>} : vector<8x4xf32>, vector<4x384xf32>, vector<8x384xf32> -> vector<8x384xf32>
    %50 = arith.addf %45, %49 : vector<8x384xf32>
    %c0_33 = arith.constant 0 : index
    %c0_34 = arith.constant 0 : index
    %51 = vector.load %arg5[%c0_33, %c0_34] : memref<8x1xf32, #tpu.memory_space<vmem>>, vector<8x1xf32>
    %52 = vector.broadcast %51 : vector<8x1xf32> to vector<8x384xf32>
    %53 = arith.addf %50, %52 : vector<8x384xf32>
    %c0_35 = arith.constant 0 : index
    %c0_36 = arith.constant 0 : index
    %c0_37 = arith.constant 0 : index
    %54 = vector.load %arg6[%c0_35, %c0_36, %c0_37] : memref<1x8x384xf32, #tpu.memory_space<vmem>>, vector<1x8x384xf32>
    %55 = vector.shape_cast %54 : vector<1x8x384xf32> to vector<8x384xf32>
    %56 = vector.shape_cast %53 : vector<8x384xf32> to vector<1x8x384xf32>
    tpu.vector_store %arg6[%c0_35, %c0_36, %c0_37], %56 {strides = array<i32>} : memref<1x8x384xf32, #tpu.memory_space<vmem>>, vector<1x8x384xf32>,
    return
  }
  func.func @transform_0(%arg0: i32, %arg1: i32) -> (i32, i32, i32) {
    %c0_i32 = arith.constant 0 : i32
    %c0_i32_0 = arith.constant 0 : i32
    return %arg0, %c0_i32, %arg1 : i32, i32, i32
  }
  func.func @transform_1(%arg0: i32, %arg1: i32) -> (i32, i32, i32) {
    %c1_i32 = arith.constant 1 : i32
    %0 = arith.addi %arg1, %c1_i32 : i32
    %c3_i32 = arith.constant 3 : i32
    %1 = arith.muli %0, %c3_i32 : i32
    %c0_i32 = arith.constant 0 : i32
    %c0_i32_0 = arith.constant 0 : i32
    return %arg0, %c0_i32, %1 : i32, i32, i32
  }
  func.func @transform_2(%arg0: i32, %arg1: i32) -> (i32, i32, i32) {
    %c0_i32 = arith.constant 0 : i32
    %c0_i32_0 = arith.constant 0 : i32
    %c0_i32_1 = arith.constant 0 : i32
    %c0_i32_2 = arith.constant 0 : i32
    return %c0_i32, %c0_i32_0, %c0_i32_1 : i32, i32, i32
  }
  func.func @transform_3(%arg0: i32, %arg1: i32) -> (i32, i32) {
    %c0_i32 = arith.constant 0 : i32
    %c0_i32_0 = arith.constant 0 : i32
    %c0_i32_1 = arith.constant 0 : i32
    return %c0_i32, %c0_i32_0 : i32, i32
  }
  func.func @transform_4(%arg0: i32, %arg1: i32) -> (i32, i32, i32) {
    %c0_i32 = arith.constant 0 : i32
    %c0_i32_0 = arith.constant 0 : i32
    return %arg0, %c0_i32, %arg1 : i32, i32, i32
  }
}

</mosaic_0001>

<bundles_post_ra>
// kernel: tpu_custom_call.1
= control target key start
LH: loop header
LB: loop body
LE: loop exit
PB: predicated region body
PF: predicated region fallthrough
CT: control target
= control target key end

     0   :  { %9 = vsyncpa [#allocation3], 0  ;;  %s1671_s0 = inlined_call_operand.vmem [shape: f32[2,4,512], index: 0, kind: input, shape index: {}]   ;;  %s1672_s1 = inlined_call_operand.vmem [shape: f32[2,4,512], index: 1, kind: input, shape index: {}]   ;;  %s1673_s2 = inlined_call_operand.vmem [shape: f32[9,8,4], index: 2, kind: input, shape index: {}]   ;;  %s1674_s3 = inlined_call_operand.vmem [shape: f32[8,1], index: 3, kind: input, shape index: {}]   ;;  %s1675_s4 = inlined_call_operand.hbm [shape: f32[2,8,384], index: 4, kind: output, shape index: {}]  }
   0x1   :  { %11 = vsyncpa [#allocation3 + $0x1], 0  ;;  %s1446_s15 = smov 0   ;;  %s1448_s16 = smov 0  }
   0x2   :  { %s1450_s17 = smov 0   ;;  %s1452_s18 = smov 0  }
   0x3   :  { %s1454_s19 = smov 0   ;;  %s1456_s20 = smov 0  }
   0x4 LB: > { %s1186_s21 = sadd.s32 4294967295, %s1410_s20   ;;  %s1187_s22 = sadd.s32 4294967294, %s1410_s20   ;;  %s1410_s20 = sphi %s1456_s20, %s17_s20   ;;  %s1406_s19 = sphi %s1454_s19, %s1682_s19   ;;  %s1402_s18 = sphi %s1452_s18, %s1681_s18   ;;  %s1398_s17 = sphi %s1450_s17, %s1680_s17   ;;  %s1394_s16 = sphi %s1448_s16, %s1679_s16   ;;  %s1390_s15 = sphi %s1446_s15, %s1678_s15  }
   0x5   : > { %s29_s23 = sadd.s32 1, %s1406_s19  ;;  %s140_s24 = sadd.s32 1, %s1398_s17 }
   0x6   : > { %p31_p0 = scmp.ge.s32.totalorder %s29_s23, 2  ;;  %p150_p1 = scmp.ne.s32.totalorder %s1398_s17, %s1394_s16 }
   0x7   : > { %p151_p2 = scmp.eq.s32.totalorder %s1186_s21, 1  ;;  %p156_p3 = scmp.ne.s32.totalorder %s1394_s16, %s1390_s15 }
   0x8   : > { %s1684_s23 = smov (%p31_p0, %s29_s23), 0  ;;  %p157_p5 = scmp.eq.s32.totalorder %s1187_s22, 1 }
   0x9   : > { %p1486_p4 = por %p151_p2, %p150_p1  ;;  %s135_s26 = ssub.s32 %s1406_s19, %s1684_s23 }
   0xa   : > { %p1190_p6 = scmp.ge.s32.totalorder %s1410_s20, 1  ;;  %p138_p7 = scmp.eq.s32.totalorder %s135_s26, 0 }
   0xb   : > { %p1493_p8 = por %p157_p5, %p156_p3  ;;  %p217_p9 = scmp.lt.s32.totalorder %s1410_s20, 3 }
   0xc   : > { %s1499_s28 = scalar_select %p138_p7, %s1398_s17, %s140_s24  }
   0xd   : > { %p218_p10 = pnand %p1190_p6, %p217_p9 }
   0xe   : > { %p266_p11 = scmp.lt.s32.totalorder (!%p218_p10), %s1402_s18, 1  ;;  %s1412_s12 = smov (!%p218_p10), 127  }
   0xf   : > { %221 = sbr.rel (%p218_p10) target bundleno = 364 (0x16c), region = 36  ;;  %s1413_s13 = smov (!%p218_p10), 126  }
  0x10   : > { %s1414_s14 = smov (!%p218_p10), 110   ;;  %s1415_s21 = smov (!%p218_p10), 109  }
  0x11   : > { %s1416_s22 = smov (!%p218_p10), 108   ;;  %s1417_s24 = smov (!%p218_p10), 92  }
  0x12   : > { %s1418_s26 = smov (!%p218_p10), 91   ;;  %s1265_s10 = smul.u32 (!%p218_p10), 24, %s1402_s18 }
  0x14   : > { %s267_s29 = scalar_select %p266_p11, %s1402_s18, 1  ;;  %vm323_vm0 = vcmask 1043456   ;;  %vm319_vm1 = vcmask 31744   ;;  %v303_v8 = vld [vmem:[%s1673_s2] sm:$0xff]  ;;  %vm469_vm2 = vcmask 1031168   ;;  %vm315_vm3 = vcmask 1039360  }
  0x15   : > { %v1195_v16 = vld [vmem:[%s1673_s2 + $0x8] sm:$0xff]  ;;  %vm555_vm4 = vcmask 900096   ;;  %v1208_v24 = vld [vmem:[%s1673_s2 + $0x10] sm:$0xff]  ;;  %v1215_v30 = vld [vmem:[%s1673_s2 + $0x18] sm:$0xff]  ;;  %vm641_vm5 = vcmask 891904   ;;  %vm727_vm6 = vcmask 883712  }
  0x16   : > { %s1260_s30 = sshll.u32 %s267_s29, 4  ;;  %s1419_s29 = smov 90   ;;  %v1222_v38 = vld [vmem:[%s1673_s2 + $0x20] sm:$0xff]  ;;  %v1229_v44 = vld [vmem:[%s1673_s2 + $0x28] sm:$0xff]  ;;  %vm813_vm7 = vcmask 752640   ;;  %vm899_vm8 = vcmask 744448  }
  0x17   : > { %s1262_s5 = sadd.s32 12, %s1260_s30  ;;  %s273_s8 = scalar_lea.vmem %s1671_s0, %s1260_s30  ;;  %v1236_v49 = vld [vmem:[%s1673_s2 + $0x30] sm:$0xff]  ;;  %v1061_v54 = vld [vmem:[%s1674_s3] sm:$0xff]  ;;  %v1420_v55 = vmov 0   ;;  %v1243_v59 = vld [vmem:[%s1673_s2 + $0x38] sm:$0xff]  ;;  %vm985_vm9 = vcmask 736256  }
  0x18   : > { %s288_s11 = scalar_lea.vmem %s1672_s1, %s1262_s5  ;;  %v292_v0 = vld [vmem:[%s273_s8] sm:$0xff]  ;;  %v293_v1 = vld [vmem:[%s273_s8 + $0x8] sm:$0xf]  ;;  %1330 = vset.pattern.permute.xlu2 %v1420_v55  ;;  %1331 = vset.pattern.permute.xlu0 %v1420_v55  ;;  %s258_s8 = sand.u32 1, %s1394_s16  }
  0x19   : > { %v294_v2 = vld [vmem:[%s288_s11] sm:$0xf]  ;;  %297 = vst [vmem:[#allocation1] ss:$2 sm:$0xff] %v292_v0  ;;  %s1264_s9 = smul.u32 24, %s258_s8  ;;  %s1352_s5 = scalar_lea.hbm %s1675_s4, 48 }
  0x1a   : > { %313 = vrot.lane.b32.xlu0 %v294_v2, %s1412_s12  ;;  %299 = vst [vmem:[#allocation1 + $0x10] ss:$2 sm:$0xff] %v293_v1 }
  0x1b   : > { %s260_s18 = scalar_lea.vmem [#allocation2], %s1264_s9 }
  0x20   : > { %v300_v3 = vld.sshfl [vmem:[#allocation1] sm:$0xff pattern:$0x75316420]  ;;  %v1512_v5 = vld.sshfl [vmem:[#allocation1 + $0x8] sm:$0xff pattern:$0x75316420] }
  0x21   : > { %307 = vrot.lane.b32.xlu1 %v300_v3, %s1412_s12  ;;  %v1509_v4 = vld.sshfl [vmem:[#allocation1 + $0x10] sm:$0xff pattern:$0x75316420]  ;;  %461 = vrot.lane.b32.xlu2 %v300_v3, %s1413_s13 }
  0x22   : > { %311 = vrot.lane.b32.xlu0 %v1509_v4, %s1412_s12  ;;  %1202 = vmatpush.msk.msra.mxu3 %vm323_vm0, %v300_v3 }
  0x23   : > { %1203 = vmatmul.msk.f32.vlgmr.msra.gmra.mxu3 %vm319_vm1, %v303_v8 }
  0x29   : > { %309 = vrot.lane.b32.xlu1 %v1512_v5, %s1412_s12  ;;  %463 = vrot.lane.b32.xlu2 %v1512_v5, %s1413_s13 }
  0x2a   : > { %465 = vrot.lane.b32.xlu0 %v1509_v4, %s1413_s13 }
  0x31   : > { %549 = vrot.lane.b32.xlu1 %v1512_v5, %s1414_s14  ;;  %551 = vrot.lane.b32.xlu2 %v1509_v4, %s1414_s14 }
  0x32   : > { %467 = vrot.lane.b32.xlu0 %v294_v2, %s1413_s13  ;;  %s1087_s13 = scalar_lea.hbm %s1675_s4, %s1265_s10 }
  0x39   : > { %547 = vrot.lane.b32.xlu1 %v300_v3, %s1414_s14  ;;  %553 = vrot.lane.b32.xlu2 %v294_v2, %s1414_s14  ;;  %s1089_s14 = sshll.u32 %s260_s18, 4  ;;  %s1090_s14 = int_to_ptr.vmem [resolvable:$true] %s1089_s14 }
  0x3a   : > { %637 = vrot.lane.b32.xlu0 %v1509_v4, %s1415_s21 }
  0x41   : > { %639 = vrot.lane.b32.xlu1 %v294_v2, %s1415_s21  ;;  %633 = vrot.lane.b32.xlu2 %v300_v3, %s1415_s21 }
  0x42   : > { %635 = vrot.lane.b32.xlu0 %v1512_v5, %s1415_s21  ;;  %s1091_s21 = sshll.u32 %s1087_s13, 4  ;;  %s1092_s21 = int_to_ptr.hbm [resolvable:$true] %s1091_s21 }
  0x49   : > { %719 = vrot.lane.b32.xlu1 %v300_v3, %s1416_s22  ;;  %721 = vrot.lane.b32.xlu2 %v1512_v5, %s1416_s22 }
  0x4a   : > { %805 = vrot.lane.b32.xlu0 %v300_v3, %s1417_s24 }
  0x51   : > { %807 = vrot.lane.b32.xlu1 %v1512_v5, %s1417_s24  ;;  %723 = vrot.lane.b32.xlu2 %v1509_v4, %s1416_s22 }
  0x52   : > { %725 = vrot.lane.b32.xlu0 %v294_v2, %s1416_s22  ;;  %s1074_s22 = scalar_lea.sflag [#allocation3], %s258_s8 }
  0x59   : > { %809 = vrot.lane.b32.xlu1 %v1509_v4, %s1417_s24  ;;  %893 = vrot.lane.b32.xlu2 %v1512_v5, %s1418_s26 }
  0x5a   : > { %895 = vrot.lane.b32.xlu0 %v1509_v4, %s1418_s26 }
  0x61   : > { %811 = vrot.lane.b32.xlu1 %v294_v2, %s1417_s24  ;;  %891 = vrot.lane.b32.xlu2 %v300_v3, %s1418_s26  ;;  %s1346_s24 = sshra.s32 %s1092_s21, 4  ;;  %s1347_s24 = int_to_ptr.hbm [resolvable:$true] %s1346_s24 }
  0x62   : > { %897 = vrot.lane.b32.xlu0 %v294_v2, %s1418_s26  ;;  %s1348_s26 = scalar_lea.hbm %s1347_s24, 24  ;;  %p1353_p1 = scmp.lt.s32.totalorder %s1347_s24, %s1675_s4 }
  0x63   : > { %p1349_p12 = scmp.ne.s32.totalorder %s1347_s24, %s1348_s26  ;;  %p1354_p2 = scmp.lt.s32.totalorder %s1352_s5, %s1348_s26 }
  0x65   : > { %p1350_p13 = pnand %p1349_p12, %p1486_p4  ;;  %p1355_p3 = por %p1354_p2, %p1353_p1 }
  0x67   : > { %p1351_p0 = pneg %p1350_p13 }
  0x69   : > { %981 = vrot.lane.b32.xlu1 %v1509_v4, %s1419_s29  ;;  %983 = vrot.lane.b32.xlu2 %v294_v2, %s1419_s29  ;;  %p1356_p5 = pnand %p1355_p3, %p1351_p0 }
  0x6a   : > { %977 = vrot.lane.b32.xlu0 %v300_v3, %s1419_s29  ;;  %v1250_v3 = vld [vmem:[%s1673_s2 + $0x40] sm:$0xff] }
  0x71   : > { %979 = vrot.lane.b32.xlu1 %v1512_v5, %s1419_s29  ;;  %1064 = vperm.xlu2 %1330, %v1061_v54  }
  0x7b   : > { %v462_v6 = vpop.permute.xlu2 %461 }
  0x83   : > { %v464_v7 = vpop.permute.xlu2 %463 }
  0x84   : > { %v470_v14 = vsel %vm469_vm2, %v462_v6, %v464_v7 }
  0x8b   : > { %v552_v9 = vpop.permute.xlu2 %551 }
  0x8c   : > { %v314_v10 = vpop.permute.xlu0 %313 }
  0x93   : > { %v308_v11 = vpop.permute.xlu1 %307  ;;  %v554_v12 = vpop.permute.xlu2 %553 }
  0x94   : > { %v312_v13 = vpop.permute.xlu0 %311  ;;  %v558_v23 = vsel %vm555_vm4, %v552_v9, %v554_v12 }
  0x95   : > { %v318_v15 = vsel %vm315_vm3, %v312_v13, %v314_v10 }
  0x96   : > { %1200 = vmatpush.msk.msra.mxu2 %vm323_vm0, %v318_v15 }
  0x97   : > { %1201 = vmatmul.msk.f32.vlgmr.msra.gmra.mxu2 %vm319_vm1, %v1195_v16 }
  0x98   : > { %1209 = vmatpush.msk.msrb.mxu2 %vm323_vm0, %v470_v14 }
  0x9b   : > { %v310_v17 = vpop.permute.xlu1 %309  ;;  %v634_v18 = vpop.permute.xlu2 %633 }
  0x9c   : > { %v466_v19 = vpop.permute.xlu0 %465  ;;  %v316_v20 = vsel %vm315_vm3, %v308_v11, %v310_v17  ;;  %v317_v21 = vsel %vm315_vm3, %v310_v17, %v312_v13 }
  0x9d   : > { %1196 = vmatpush.msk.msra.mxu0 %vm323_vm0, %v316_v20  ;;  %1198 = vmatpush.msk.msra.mxu1 %vm323_vm0, %v317_v21  ;;  %v471_v22 = vsel %vm469_vm2, %v464_v7, %v466_v19 }
  0x9e   : > { %1211 = vmatpush.msk.msrb.mxu3 %vm323_vm0, %v471_v22  ;;  %1197 = vmatmul.msk.f32.vlgmr.msra.gmra.mxu0 %vm319_vm1, %v1195_v16 }
  0x9f   : > { %1204 = vmatpush.msk.msrb.mxu0 %vm323_vm0, %v1512_v5  ;;  %1199 = vmatmul.msk.f32.vlgmr.msra.gmra.mxu1 %vm319_vm1, %v1195_v16 }
  0xa0   : > { %1220 = vmatpush.msk.msra.mxu3 %vm323_vm0, %v558_v23  ;;  %1206 = vmatpush.msk.msrb.mxu1 %vm323_vm0, %v1509_v4 }
  0xa1   : > { %1210 = vmatmul.msk.f32.vlgmr.msrb.gmra.mxu2 %vm319_vm1, %v1208_v24  ;;  %1212 = vmatmul.msk.f32.vlgmr.msrb.gmra.mxu3 %vm319_vm1, %v1208_v24 }
  0xa3   : > { %v550_v25 = vpop.permute.xlu1 %549  ;;  %v722_v28 = vpop.permute.xlu2 %721 }
  0xa4   : > { %v557_v26 = vsel %vm555_vm4, %v550_v25, %v552_v9  ;;  %v468_v27 = vpop.permute.xlu0 %467 }
  0xa5   : > { %v472_v29 = vsel %vm469_vm2, %v466_v19, %v468_v27  ;;  %1218 = vmatpush.msk.msra.mxu2 %vm323_vm0, %v557_v26 }
  0xa6   : > { %1213 = vmatpush.msk.msra.mxu0 %vm323_vm0, %v472_v29  ;;  %v416_v12 = vpop.f32.mrf.mxu3 }
  0xa7   : > { %1205 = vmatmul.msk.f32.vlgmr.msrb.gmra.mxu0 %vm319_vm1, %v303_v8  ;;  %1207 = vmatmul.msk.f32.vlgmr.msrb.gmra.mxu1 %vm319_vm1, %v303_v8 }
  0xa9   : > { %1219 = vmatmul.msk.f32.vlgmr.msra.gmra.mxu2 %vm319_vm1, %v1215_v30  ;;  %1221 = vmatmul.msk.f32.vlgmr.msra.gmra.mxu3 %vm319_vm1, %v1215_v30 }
  0xab   : > { %v548_v31 = vpop.permute.xlu1 %547  ;;  %v724_v34 = vpop.permute.xlu2 %723 }
  0xac   : > { %v556_v32 = vsel %vm555_vm4, %v548_v31, %v550_v25  ;;  %v638_v33 = vpop.permute.xlu0 %637  ;;  %v729_v41 = vsel %vm727_vm6, %v722_v28, %v724_v34 }
  0xad   : > { %1216 = vmatpush.msk.msra.mxu1 %vm323_vm0, %v556_v32 }
  0xaf   : > { %1214 = vmatmul.msk.f32.vlgmr.msra.gmra.mxu0 %vm319_vm1, %v1208_v24  ;;  %1217 = vmatmul.msk.f32.vlgmr.msra.gmra.mxu1 %vm319_vm1, %v1215_v30 }
  0xb3   : > { %v640_v35 = vpop.permute.xlu1 %639  ;;  %v894_v42 = vpop.permute.xlu2 %893 }
  0xb4   : > { %v644_v36 = vsel %vm641_vm5, %v638_v33, %v640_v35  ;;  %v636_v37 = vpop.permute.xlu0 %635 }
  0xb5   : > { %v642_v39 = vsel %vm641_vm5, %v634_v18, %v636_v37  ;;  %v643_v40 = vsel %vm641_vm5, %v636_v37, %v638_v33  ;;  %1227 = vmatpush.msk.msrb.mxu2 %vm323_vm0, %v644_v36 }
  0xb6   : > { %1225 = vmatpush.msk.msrb.mxu1 %vm323_vm0, %v643_v40  ;;  %1223 = vmatpush.msk.msrb.mxu0 %vm323_vm0, %v642_v39 }
  0xb7   : > { %1224 = vmatmul.msk.f32.vlgmr.msrb.gmra.mxu0 %vm319_vm1, %v1222_v38  ;;  %1228 = vmatmul.msk.f32.vlgmr.msrb.gmra.mxu2 %vm319_vm1, %v1222_v38 }
  0xb8   : > { %1226 = vmatmul.msk.f32.vlgmr.msrb.gmra.mxu1 %vm319_vm1, %v1222_v38  ;;  %1232 = vmatpush.msk.msra.mxu0 %vm323_vm0, %v729_v41 }
  0xbb   : > { %v720_v43 = vpop.permute.xlu1 %719  ;;  %v892_v47 = vpop.permute.xlu2 %891 }
  0xbc   : > { %v728_v45 = vsel %vm727_vm6, %v720_v43, %v722_v28  ;;  %v806_v46 = vpop.permute.xlu0 %805  ;;  %v900_v53 = vsel %vm899_vm8, %v892_v47, %v894_v42 }
  0xbd   : > { %1230 = vmatpush.msk.msrb.mxu3 %vm323_vm0, %v728_v45 }
  0xbe   : > { %1231 = vmatmul.msk.f32.vlgmr.msrb.gmra.mxu3 %vm319_vm1, %v1229_v44 }
  0xbf   : > { %1233 = vmatmul.msk.f32.vlgmr.msra.gmra.mxu0 %vm319_vm1, %v1229_v44 }
  0xc3   : > { %v808_v48 = vpop.permute.xlu1 %807  ;;  %v984_v1 = vpop.permute.xlu2 %983 }
  0xc4   : > { %v814_v50 = vsel %vm813_vm7, %v806_v46, %v808_v48  ;;  %v726_v51 = vpop.permute.xlu0 %725 }
  0xc5   : > { %v730_v52 = vsel %vm727_vm6, %v724_v34, %v726_v51  ;;  %1237 = vmatpush.msk.msra.mxu2 %vm323_vm0, %v814_v50 }
  0xc6   : > { %1234 = vmatpush.msk.msra.mxu1 %vm323_vm0, %v730_v52  ;;  %1238 = vmatmul.msk.f32.vlgmr.msra.gmra.mxu2 %vm319_vm1, %v1236_v49 }
  0xc7   : > { %1235 = vmatmul.msk.f32.vlgmr.msra.gmra.mxu1 %vm319_vm1, %v1229_v44 }
  0xc8   : > { %1244 = vmatpush.msk.msrb.mxu1 %vm323_vm0, %v900_v53 }
  0xcb   : > { %v810_v56 = vpop.permute.xlu1 %809  ;;  %v1065_v53 = vpop.permute.xlu2 %1064 }
  0xcc   : > { %v815_v57 = vsel %vm813_vm7, %v808_v48, %v810_v56  ;;  %v896_v58 = vpop.permute.xlu0 %895 }
  0xcd   : > { %v901_v60 = vsel %vm899_vm8, %v894_v42, %v896_v58  ;;  %1239 = vmatpush.msk.msra.mxu3 %vm323_vm0, %v815_v57 }
  0xce   : > { %1240 = vmatmul.msk.f32.vlgmr.msra.gmra.mxu3 %vm319_vm1, %v1236_v49  ;;  %1246 = vmatpush.msk.msrb.mxu2 %vm323_vm0, %v901_v60 }
  0xcf   : > { %1245 = vmatmul.msk.f32.vlgmr.msrb.gmra.mxu1 %vm319_vm1, %v1243_v59  ;;  %1247 = vmatmul.msk.f32.vlgmr.msrb.gmra.mxu2 %vm319_vm1, %v1243_v59 }
  0xd3   : > { %v812_v61 = vpop.permute.xlu1 %811 }
  0xd4   : > { %v816_v62 = vsel %vm813_vm7, %v810_v56, %v812_v61  ;;  %v898_v63 = vpop.permute.xlu0 %897 }
  0xd5   : > { %v902_v0 = vsel %vm899_vm8, %v896_v58, %v898_v63  ;;  %1241 = vmatpush.msk.msrb.mxu0 %vm323_vm0, %v816_v62 }
  0xd6   : > { %1242 = vmatmul.msk.f32.vlgmr.msrb.gmra.mxu0 %vm319_vm1, %v1236_v49  ;;  %1248 = vmatpush.msk.msrb.mxu3 %vm323_vm0, %v902_v0 }
  0xd7   : > { %1249 = vmatmul.msk.f32.vlgmr.msrb.gmra.mxu3 %vm319_vm1, %v1243_v59 }
  0xdb   : > { %v982_v2 = vpop.permute.xlu1 %981 }
  0xdc   : > { %v988_v4 = vsel %vm985_vm9, %v982_v2, %v984_v1  ;;  %v978_v5 = vpop.permute.xlu0 %977 }
  0xdd   : > { %1255 = vmatpush.msk.msra.mxu2 %vm323_vm0, %v988_v4 }
  0xde   : > { %1256 = vmatmul.msk.f32.vlgmr.msra.gmra.mxu2 %vm319_vm1, %v1250_v3 }
  0xe3   : > { %v980_v6 = vpop.permute.xlu1 %979 }
  0xe4   : > { %v986_v7 = vsel %vm985_vm9, %v978_v5, %v980_v6  ;;  %v987_v8 = vsel %vm985_vm9, %v980_v6, %v982_v2 }
  0xe5   : > { %1251 = vmatpush.msk.msra.mxu0 %vm323_vm0, %v986_v7  ;;  %1253 = vmatpush.msk.msra.mxu1 %vm323_vm0, %v987_v8 }
  0xe6   : > { %1252 = vmatmul.msk.f32.vlgmr.msra.gmra.mxu0 %vm319_vm1, %v1250_v3  ;;  %1254 = vmatmul.msk.f32.vlgmr.msra.gmra.mxu1 %vm319_vm1, %v1250_v3 }
 0x11a   : > { %v387_v11 = vpop.f32.mrf.mxu2 }
 0x11b   : > { %v347_v9 = vpop.f32.mrf.mxu0 }
 0x11c   : > { %v367_v10 = vpop.f32.mrf.mxu1  ;;  %v417_v26 = vadd.f32 %v416_v12, %v347_v9 }
 0x124   : > { %v436_v13 = vpop.f32.mrf.mxu0  ;;  %v456_v14 = vpop.f32.mrf.mxu1 }
 0x125   : > { %v499_v15 = vpop.f32.mrf.mxu2  ;;  %v519_v16 = vpop.f32.mrf.mxu3  ;;  %v437_v25 = vadd.f32 %v436_v13, %v367_v10  ;;  %v457_v27 = vadd.f32 %v456_v14, %v387_v11 }
 0x126   : > { %v542_v31 = vadd.f32 %v499_v15, %v417_v26 }
 0x127   : > { %v543_v28 = vadd.f32 %v519_v16, %v437_v25 }
 0x12c   : > { %v539_v17 = vpop.f32.mrf.mxu0  ;;  %v585_v18 = vpop.f32.mrf.mxu1 }
 0x12d   : > { %v605_v19 = vpop.f32.mrf.mxu2  ;;  %v625_v20 = vpop.f32.mrf.mxu3  ;;  %v544_v32 = vadd.f32 %v539_v17, %v457_v27  ;;  %v628_v36 = vadd.f32 %v585_v18, %v542_v31 }
 0x12e   : > { %v629_v35 = vadd.f32 %v605_v19, %v543_v28 }
 0x12f   : > { %v630_v37 = vadd.f32 %v625_v20, %v544_v32 }
 0x134   : > { %v671_v21 = vpop.f32.mrf.mxu0 }
 0x135   : > { %v691_v22 = vpop.f32.mrf.mxu1  ;;  %v714_v40 = vadd.f32 %v671_v21, %v628_v36 }
 0x136   : > { %v715_v38 = vadd.f32 %v691_v22, %v629_v35 }
 0x13a   : > { %v711_v23 = vpop.f32.mrf.mxu2 }
 0x13b   : > { %v716_v41 = vadd.f32 %v711_v23, %v630_v37 }
 0x13c   : > { %v777_v33 = vpop.f32.mrf.mxu0 }
 0x13d   : > { %v801_v45 = vadd.f32 %v777_v33, %v715_v38 }
 0x141   : > { %v757_v24 = vpop.f32.mrf.mxu3 }
 0x142   : > { %v800_v44 = vadd.f32 %v757_v24, %v714_v40 }
 0x144   : > { %v797_v29 = vpop.f32.mrf.mxu1 }
 0x145   : > { %v802_v46 = vadd.f32 %v797_v29, %v716_v41 }
 0x149   : > { %v843_v30 = vpop.f32.mrf.mxu2 }
 0x14a   : > { %v886_v48 = vadd.f32 %v843_v30, %v800_v44 }
 0x14c   : > { %v929_v42 = vpop.f32.mrf.mxu1 }
 0x14d   : > { %v972_v54 = vadd.f32 %v929_v42, %v886_v48 }
 0x151   : > { %v863_v34 = vpop.f32.mrf.mxu3 }
 0x152   : > { %v949_v39 = vpop.f32.mrf.mxu2  ;;  %v887_v49 = vadd.f32 %v863_v34, %v801_v45 }
 0x153   : > { %v883_v43 = vpop.f32.mrf.mxu0 }
 0x154   : > { %v888_v50 = vadd.f32 %v883_v43, %v802_v46  ;;  %v973_v55 = vadd.f32 %v949_v39, %v887_v49 }
 0x15a   : > { %v969_v47 = vpop.f32.mrf.mxu3 }
 0x15b   : > { %v974_v51 = vadd.f32 %v969_v47, %v888_v50 }
 0x161   : > { %v1055_v52 = vpop.f32.mrf.mxu2 }
 0x162   : > { %v1060_v56 = vadd.f32 %v1055_v52, %v974_v51 }
 0x163   : > { %v1015_v57 = vpop.f32.mrf.mxu0  ;;  %v1035_v58 = vpop.f32.mrf.mxu1 }
 0x164   : > { %v1069_v59 = vadd.f32 %v1065_v53, %v1060_v56  ;;  %v1058_v60 = vadd.f32 %v1015_v57, %v972_v54  ;;  %v1059_v61 = vadd.f32 %v1035_v58, %v973_v55 }
 0x166   : > { %1072 = vst [vmem:[%s260_s18 + $0x10] sm:$0xff] %v1069_v59  ;;  %v1067_v62 = vadd.f32 %v1065_v53, %v1058_v60  ;;  %v1068_v63 = vadd.f32 %v1065_v53, %v1059_v61 }
 0x168   : > { %1070 = vst [vmem:[%s260_s18] sm:$0xff] %v1067_v62 }
 0x169   : > { %1071 = vst [vmem:[%s260_s18 + $0x8] sm:$0xff] %v1068_v63 }
 0x16a   : > { %1359 = shalt.err (!%p1356_p5)
}
 0x16b   : > { %1266 = dma.vmem_to_hbm [thread:$0]  (%p1486_p4), %s1090_s14, 384, %s1092_s21, %s1074_s22  }
 0x16c PF: > { %p1272_p6 = scmp.ge.s32.totalorder %s1410_s20, 2  ;;  %s1103_s8 = sand.u32 1, %s1390_s15  }
 0x16d   : > { %s1104_s9 = scalar_lea.sflag [#allocation3], %s1103_s8 }
 0x16e   : > { %p1269_p7 = pnand %p1272_p6, %p1493_p8 }
 0x170   : > { %p1270_p9 = pneg %p1269_p7 }
 0x172   : > { %1385 = dma.done.wait (%p1270_p9), %s1104_s9, 384  }
 0x173   : > { %1387 = vsyncadd (%p1270_p9), %s1104_s9, 4294966912  ;;  %s17_s20 = sadd.s32 1, %s1410_s20   ;;  %s1678_s15 = smov %s1394_s16 }
 0x174   : > { %p14_p10 = scmp.ge.s32.totalorder %s17_s20, 4   ;;  %s1679_s16 = smov %s1398_s17 }
 0x175   : > { %s1680_s17 = smov %s1499_s28  ;;  %s1681_s18 = smov %s1406_s19 }
 0x176   : > { %s1682_s19 = smov %s1684_s23  ;;  %16 = sbr.rel (!%p14_p10) target bundleno = 4 (0x4), region = 83 }
 0x17b   :  { %1110 = vsyncpa [#allocation3], 1 }
 0x17c   :  { %1112 = vsyncpa [#allocation3 + $0x1], 1 }

</bundles_post_ra>
